<compile_context>
chip_gen: v7x
topology: tpu7x:2x2x1
jax: 0.10.0
libtpu: 0.0.40
codegen_flags: <defaults>
</compile_context>

<pallas_src>
import functools

import jax
import jax.numpy as jnp
from jax.experimental import pallas as pl
from jax.experimental.pallas import tpu as pltpu


_LANE = 128
_SUBLANE = 8
_NT_DIMS = (((1,), (1,)), ((), ()))   # a @ b.T contraction for lax.dot_general


def _round_up(x, m):
    return ((x + m - 1) // m) * m


def _chip_params():
    """Generation-gated knobs: (target_block_bytes, vmem_limit_bytes, n_tensorcores)."""
    kind = ""
    try:
        kind = jax.devices()[0].device_kind.lower()
    except Exception:  # pragma: no cover - defensive, fall through to conservative
        pass
    if "v7" in kind:
        # 64 MiB VMEM per TensorCore, 2 TCs/chip: cap block size, keep headroom.
        return 4 * 1024 * 1024, 32 * 1024 * 1024, 2
    if "v5" in kind or "v6" in kind:
        # 128 MiB VMEM, 1 TC: larger streaming blocks amortize per-step overhead.
        return 8 * 1024 * 1024, 64 * 1024 * 1024, 1
    # Unknown / older chip: conservative settings that fit every generation.
    return 4 * 1024 * 1024, 32 * 1024 * 1024, 2


def _pick_tiles(n_rows, hw, itemsize, target_block_bytes, n_cores):
    """Choose (TR, THW) row/column tile sizes.

    THW == hw (full extent, no spatial split) unless even an 8-row block of
    full rows would blow the per-buffer budget, in which case H*W is tiled in
    128-lane multiples.  TR is the largest sublane multiple within the budget,
    halved (down to 8) until the row grid has >= 2 steps per TensorCore.
    Pass 2's live footprint ~= 4x block (double-buffered in + out), which the
    generation-gated targets keep well under the scoped-VMEM limit.
    """
    lane_row_bytes = _round_up(hw, _LANE) * itemsize   # VMEM layout is lane-padded
    if _SUBLANE * lane_row_bytes > target_block_bytes:
        # Huge spatial maps: tile the spatial axis too (2-D grid path).
        thw = max(_LANE,
                  (target_block_bytes // (_SUBLANE * itemsize)) // _LANE * _LANE)
        tr = _SUBLANE if n_rows >= _SUBLANE else n_rows
        return tr, thw
    tr = min(target_block_bytes // lane_row_bytes, n_rows)
    tr = max(_SUBLANE, (tr // _SUBLANE) * _SUBLANE)
    min_steps = 2 * n_cores   # keep every TensorCore fed under megacore sharding
    while pl.cdiv(n_rows, tr) < min_steps and tr > _SUBLANE:
        tr = max(_SUBLANE, (tr // 2) // _SUBLANE * _SUBLANE)
    if tr > n_rows:
        tr = n_rows           # full-extent row block (R < 8); legal for any R
    return tr, hw


# ---------------------------------------------------------------------------
# Pass 1: global average pool over the spatial (lane) axis, f32 accumulation.
# The pooled output block is resident across the spatial grid axis.
# ---------------------------------------------------------------------------
def _pool_kernel(x_ref, pooled_ref, *, inv_hw, hw, thw, mask_cols):
    # x_ref: (TR, THW) native dtype     pooled_ref: (TR, 1) f32
    j = pl.program_id(1)
    x = x_ref[...]
    if mask_cols:
        # The last spatial tile straddles the array edge; zero the out-of-bounds
        # lanes so stale VMEM never leaks into the mean.
        col = jax.lax.broadcasted_iota(jnp.int32, x.shape, 1) + j * thw
        x = jnp.where(col < hw, x, jnp.zeros_like(x))
    s = jnp.sum(x, axis=1, dtype=jnp.float32, keepdims=True)

    @pl.when(j == 0)
    def _():
        pooled_ref[...] = jnp.zeros_like(pooled_ref)

    pooled_ref[...] += s

    @pl.when(j == pl.num_programs(1) - 1)
    def _():
        pooled_ref[...] = pooled_ref[...] * inv_hw   # divide by the TRUE H*W


# ---------------------------------------------------------------------------
# Excitation: runs once (not per grid step) as tiny NT matmuls (M = B).
# ---------------------------------------------------------------------------
def _excite_kernel(p_ref, w1_ref, w2_ref, s_ref):
    # p: (B, C)   w1: (Cr, C)   w2: (C, Cr)   s: (B, C) f32
    # NT contraction (a @ b.T) avoids wrapper-side transposes; weights stay in
    # their native dtype with f32 accumulation on the MXU.
    w1 = w1_ref[...]
    w2 = w2_ref[...]
    p = p_ref[...].astype(w1.dtype)
    h = jax.lax.dot_general(p, w1, _NT_DIMS, preferred_element_type=jnp.float32)
    h = jnp.maximum(h, 0.0).astype(w2.dtype)
    z = jax.lax.dot_general(h, w2, _NT_DIMS, preferred_element_type=jnp.float32)
    s_ref[...] = jax.nn.sigmoid(z)


# ---------------------------------------------------------------------------
# Pass 2: per-row channel scale, multiply in the native dtype.
# (One extra rounding of the f32 sigmoid for bf16 inputs; exact for f32.)
# ---------------------------------------------------------------------------
def _scale_kernel(s_ref, x_ref, o_ref):
    # s_ref: (TR, 1) f32     x_ref/o_ref: (TR, THW) native dtype
    o_ref[...] = x_ref[...] * s_ref[...].astype(o_ref.dtype)


@functools.partial(jax.jit, static_argnames=("target_block_bytes",))
def se_block(x, w1, w2, *, target_block_bytes=None):
    """x: (B, C, H, W).  w1: (C//r, C), w2: (C, C//r) (PyTorch nn.Linear layout, no bias)."""
    B, C, H, W = x.shape
    HW = H * W
    R = B * C

    tgt, vmem_limit, n_cores = _chip_params()
    if target_block_bytes is not None:
        tgt = target_block_bytes
    TR, THW = _pick_tiles(R, HW, x.dtype.itemsize, tgt, n_cores)
    n_row = pl.cdiv(R, TR)
    n_hw = pl.cdiv(HW, THW)

    x2d = x.reshape(R, HW)   # free reshape; NO padding / slicing (saves 2 HBM passes)

    cparams_pool = pltpu.CompilerParams(
        dimension_semantics=("parallel", "arbitrary"),
        vmem_limit_bytes=vmem_limit,
    )
    cparams_scale = pltpu.CompilerParams(
        dimension_semantics=("parallel", "parallel"),
        vmem_limit_bytes=vmem_limit,
    )

    # --- pass 1: pooled means (f32 accumulation) ------------------------------
    pooled = pl.pallas_call(
        functools.partial(
            _pool_kernel,
            inv_hw=1.0 / HW,
            hw=HW,
            thw=THW,
            mask_cols=(n_hw > 1 and HW % THW != 0),
        ),
        out_shape=jax.ShapeDtypeStruct((R, 1), jnp.float32),
        grid_spec=pltpu.PrefetchScalarGridSpec(
            num_scalar_prefetch=0,
            grid=(n_row, n_hw),
            in_specs=[pl.BlockSpec((TR, THW), lambda i, j: (i, j))],
            out_specs=pl.BlockSpec((TR, 1), lambda i, j: (i, 0)),
        ),
        compiler_params=cparams_pool,
    )(x2d)

    # --- excitation: two tiny FCs + ReLU + sigmoid, run once ------------------
    scales = pl.pallas_call(
        _excite_kernel,
        out_shape=jax.ShapeDtypeStruct((B, C), jnp.float32),
    )(pooled.reshape(B, C), w1, w2)

    # --- pass 2: channel-wise scale on the streaming slab ---------------------
    out2d = pl.pallas_call(
        _scale_kernel,
        out_shape=jax.ShapeDtypeStruct((R, HW), x.dtype),
        grid_spec=pltpu.PrefetchScalarGridSpec(
            num_scalar_prefetch=0,
            grid=(n_row, n_hw),
            in_specs=[
                pl.BlockSpec((TR, 1), lambda i, j: (i, 0)),
                pl.BlockSpec((TR, THW), lambda i, j: (i, j)),
            ],
            out_specs=pl.BlockSpec((TR, THW), lambda i, j: (i, j)),
        ),
        compiler_params=cparams_scale,
    )(scales.reshape(R, 1), x2d)

    return out2d.reshape(B, C, H, W)


def se_block_ref(x, w1, w2):
    # Pure-JAX reference mirroring the PyTorch forward.
    y = jnp.mean(x, axis=(2, 3))                 # (B, C)
    y = jnp.maximum(y @ w1.T, 0.0)               # (B, C//r)
    y = jax.nn.sigmoid(y @ w2.T)                 # (B, C)
    return x * y[:, :, None, None]


if __name__ == "__main__":
    key = jax.random.PRNGKey(0)

    def _run_case(k, B, C, H, W, r, target_block_bytes=None):
        k_x, k_w1, k_w2 = jax.random.split(k, 3)
        Cr = max(C // r, 1)
        x = jax.random.normal(k_x, (B, C, H, W), dtype=jnp.float32)
        # PyTorch nn.Linear weight layout: (out, in), no bias.
        w1 = jax.random.normal(k_w1, (Cr, C), dtype=jnp.float32) * 0.1
        w2 = jax.random.normal(k_w2, (C, Cr), dtype=jnp.float32) * 0.1
        out = jax.block_until_ready(
            se_block(x, w1, w2, target_block_bytes=target_block_bytes))
        ref = se_block_ref(x, w1, w2)
        assert out.shape == x.shape
        assert jnp.allclose(out, ref, atol=1e-5, rtol=1e-5), (
            f"mismatch vs reference for shape {(B, C, H, W)}")

    k0, k1, k2 = jax.random.split(key, 3)
    # Base case (lane-aligned spatial, matches the module defaults r=16).
    _run_case(k0, B=2, C=32, H=16, W=16, r=16)
    # Awkward shapes: HW % 128 != 0 and R % TR != 0 exercise the masked tails.
    _run_case(k1, B=5, C=12, H=7, W=7, r=4)
    # Tiny forced block budget exercises the spatial-split (2-D reduction) path.
    _run_case(k2, B=2, C=16, H=20, W=20, r=4, target_block_bytes=8 * 128 * 4)

    print("KERNEL_OK")
</pallas_src>

<mosaic_0001>
module attributes {stable_mosaic.version = 11 : i64} {
  func.func @_pool_kernel(%arg0: i32, %arg1: i32, %arg2: memref<16x256xf32, #tpu.memory_space<vmem>>, %arg3: memref<16x1xf32, #tpu.memory_space<vmem>>) attributes {dimension_semantics = [#tpu.dimension_semantics<parallel>, #tpu.dimension_semantics<arbitrary>], iteration_bounds = array<i64: 4, 1>, scalar_prefetch = 0 : i64, scratch_operands = 0 : i64, tpu.core_type = #tpu.core_type<tc>, window_params = [{transform_indices = @transform_0, window_bounds = array<i64: 16, 256>}, {transform_indices = @transform_1, window_bounds = array<i64: 16, 1>}]} {
    %c0 = arith.constant 0 : index
    %c0_0 = arith.constant 0 : index
    %0 = vector.load %arg2[%c0, %c0_0] : memref<16x256xf32, #tpu.memory_space<vmem>>, vector<16x256xf32>
    %cst = arith.constant dense<0.000000e+00> : vector<16xf32>
    %1 = vector.multi_reduction <add>, %0, %cst [1] : vector<16x256xf32> to vector<16xf32>
    %2 = vector.shape_cast %1 : vector<16xf32> to vector<16x1xf32>
    %c0_i32 = arith.constant 0 : i32
    %3 = arith.cmpi eq, %arg1, %c0_i32 : i32
    %4 = arith.extui %3 : i1 to i32
    %c0_i32_1 = arith.constant 0 : i32
    %5 = arith.cmpi ne, %4, %c0_i32_1 : i32
    scf.if %5 {
      %cst_8 = arith.constant 0.000000e+00 : f32
      %12 = vector.broadcast %cst_8 : f32 to vector<16x1xf32>
      %c0_9 = arith.constant 0 : index
      %c0_10 = arith.constant 0 : index
      %13 = vector.load %arg3[%c0_9, %c0_10] : memref<16x1xf32, #tpu.memory_space<vmem>>, vector<16x1xf32>
      tpu.vector_store %arg3[%c0_9, %c0_10], %12 {strides = array<i32>} : memref<16x1xf32, #tpu.memory_space<vmem>>, vector<16x1xf32>,
    } else {
    }
    %c0_2 = arith.constant 0 : index
    %c0_3 = arith.constant 0 : index
    %6 = vector.load %arg3[%c0_2, %c0_3] : memref<16x1xf32, #tpu.memory_space<vmem>>, vector<16x1xf32>
    %7 = arith.addf %6, %2 : vector<16x1xf32>
    %c0_4 = arith.constant 0 : index
    %c0_5 = arith.constant 0 : index
    %8 = vector.load %arg3[%c0_4, %c0_5] : memref<16x1xf32, #tpu.memory_space<vmem>>, vector<16x1xf32>
    tpu.vector_store %arg3[%c0_4, %c0_5], %7 {strides = array<i32>} : memref<16x1xf32, #tpu.memory_space<vmem>>, vector<16x1xf32>,
    %c0_i32_6 = arith.constant 0 : i32
    %9 = arith.cmpi eq, %arg1, %c0_i32_6 : i32
    %10 = arith.extui %9 : i1 to i32
    %c0_i32_7 = arith.constant 0 : i32
    %11 = arith.cmpi ne, %10, %c0_i32_7 : i32
    scf.if %11 {
      %c0_8 = arith.constant 0 : index
      %c0_9 = arith.constant 0 : index
      %12 = vector.load %arg3[%c0_8, %c0_9] : memref<16x1xf32, #tpu.memory_space<vmem>>, vector<16x1xf32>
      %cst_10 = arith.constant 3.906250e-03 : f32
      %13 = vector.broadcast %cst_10 : f32 to vector<16x1xf32>
      %14 = arith.mulf %12, %13 : vector<16x1xf32>
      %c0_11 = arith.constant 0 : index
      %c0_12 = arith.constant 0 : index
      %15 = vector.load %arg3[%c0_11, %c0_12] : memref<16x1xf32, #tpu.memory_space<vmem>>, vector<16x1xf32>
      tpu.vector_store %arg3[%c0_11, %c0_12], %14 {strides = array<i32>} : memref<16x1xf32, #tpu.memory_space<vmem>>, vector<16x1xf32>,
    } else {
    }
    return
  }
  func.func @transform_0(%arg0: i32, %arg1: i32) -> (i32, i32) {
    %c0_i32 = arith.constant 0 : i32
    return %arg0, %arg1 : i32, i32
  }
  func.func @transform_1(%arg0: i32, %arg1: i32) -> (i32, i32) {
    %c0_i32 = arith.constant 0 : i32
    %c0_i32_0 = arith.constant 0 : i32
    return %arg0, %c0_i32 : i32, i32
  }
}

module attributes {stable_mosaic.version = 11 : i64} {
  func.func @_excite_kernel(%arg0: memref<2x32xf32, #tpu.memory_space<vmem>>, %arg1: memref<2x32xf32, #tpu.memory_space<vmem>>, %arg2: memref<32x2xf32, #tpu.memory_space<vmem>>, %arg3: memref<2x32xf32, #tpu.memory_space<vmem>>) attributes {dimension_semantics = [], scalar_prefetch = 0 : i64, scratch_operands = 0 : i64, tpu.core_type = #tpu.core_type<tc>} {
    %c0 = arith.constant 0 : index
    %c0_0 = arith.constant 0 : index
    %0 = vector.load %arg1[%c0, %c0_0] : memref<2x32xf32, #tpu.memory_space<vmem>>, vector<2x32xf32>
    %c0_1 = arith.constant 0 : index
    %c0_2 = arith.constant 0 : index
    %1 = vector.load %arg2[%c0_1, %c0_2] : memref<32x2xf32, #tpu.memory_space<vmem>>, vector<32x2xf32>
    %c0_3 = arith.constant 0 : index
    %c0_4 = arith.constant 0 : index
    %2 = vector.load %arg0[%c0_3, %c0_4] : memref<2x32xf32, #tpu.memory_space<vmem>>, vector<2x32xf32>
    %cst = arith.constant dense<0.000000e+00> : vector<2x2xf32>
    %3 = tpu.matmul %2, %0, %cst {dimension_numbers = #tpu.dot_dimension_numbers<[1], [1], [0], [0], [0, 0, 1, 0], [], []>} : vector<2x32xf32>, vector<2x32xf32>, vector<2x2xf32> -> vector<2x2xf32>
    %cst_5 = arith.constant 0.000000e+00 : f32
    %4 = vector.broadcast %cst_5 : f32 to vector<2x2xf32>
    %5 = arith.maximumf %3, %4 : vector<2x2xf32>
    %cst_6 = arith.constant dense<0.000000e+00> : vector<2x32xf32>
    %6 = tpu.matmul %5, %1, %cst_6 {dimension_numbers = #tpu.dot_dimension_numbers<[1], [1], [0], [0], [0, 0, 1, 0], [], []>} : vector<2x2xf32>, vector<32x2xf32>, vector<2x32xf32> -> vector<2x32xf32>
    %7 = arith.negf %6 : vector<2x32xf32>
    %8 = math.exp %7 : vector<2x32xf32>
    %cst_7 = arith.constant 1.000000e+00 : f32
    %9 = vector.broadcast %cst_7 : f32 to vector<2x32xf32>
    %10 = arith.addf %9, %8 : vector<2x32xf32>
    %11 = arith.divf %9, %10 : vector<2x32xf32>
    %c0_8 = arith.constant 0 : index
    %c0_9 = arith.constant 0 : index
    %12 = vector.load %arg3[%c0_8, %c0_9] : memref<2x32xf32, #tpu.memory_space<vmem>>, vector<2x32xf32>
    tpu.vector_store %arg3[%c0_8, %c0_9], %11 {strides = array<i32>} : memref<2x32xf32, #tpu.memory_space<vmem>>, vector<2x32xf32>,
    return
  }
}

module attributes {stable_mosaic.version = 11 : i64} {
  func.func @_scale_kernel(%arg0: i32, %arg1: i32, %arg2: memref<16x1xf32, #tpu.memory_space<vmem>>, %arg3: memref<16x256xf32, #tpu.memory_space<vmem>>, %arg4: memref<16x256xf32, #tpu.memory_space<vmem>>) attributes {dimension_semantics = [#tpu.dimension_semantics<parallel>, #tpu.dimension_semantics<parallel>], iteration_bounds = array<i64: 4, 1>, scalar_prefetch = 0 : i64, scratch_operands = 0 : i64, tpu.core_type = #tpu.core_type<tc>, window_params = [{transform_indices = @transform_0, window_bounds = array<i64: 16, 1>}, {transform_indices = @transform_1, window_bounds = array<i64: 16, 256>}, {transform_indices = @transform_2, window_bounds = array<i64: 16, 256>}]} {
    %c0 = arith.constant 0 : index
    %c0_0 = arith.constant 0 : index
    %0 = vector.load %arg3[%c0, %c0_0] : memref<16x256xf32, #tpu.memory_space<vmem>>, vector<16x256xf32>
    %c0_1 = arith.constant 0 : index
    %c0_2 = arith.constant 0 : index
    %1 = vector.load %arg2[%c0_1, %c0_2] : memref<16x1xf32, #tpu.memory_space<vmem>>, vector<16x1xf32>
    %2 = vector.broadcast %1 : vector<16x1xf32> to vector<16x256xf32>
    %3 = arith.mulf %0, %2 : vector<16x256xf32>
    %c0_3 = arith.constant 0 : index
    %c0_4 = arith.constant 0 : index
    %4 = vector.load %arg4[%c0_3, %c0_4] : memref<16x256xf32, #tpu.memory_space<vmem>>, vector<16x256xf32>
    tpu.vector_store %arg4[%c0_3, %c0_4], %3 {strides = array<i32>} : memref<16x256xf32, #tpu.memory_space<vmem>>, vector<16x256xf32>,
    return
  }
  func.func @transform_0(%arg0: i32, %arg1: i32) -> (i32, i32) {
    %c0_i32 = arith.constant 0 : i32
    %c0_i32_0 = arith.constant 0 : i32
    return %arg0, %c0_i32 : i32, i32
  }
  func.func @transform_1(%arg0: i32, %arg1: i32) -> (i32, i32) {
    %c0_i32 = arith.constant 0 : i32
    return %arg0, %arg1 : i32, i32
  }
  func.func @transform_2(%arg0: i32, %arg1: i32) -> (i32, i32) {
    %c0_i32 = arith.constant 0 : i32
    return %arg0, %arg1 : i32, i32
  }
}

</mosaic_0001>

<bundles_post_ra>
// kernel: se_block.3
= control target key start
LH: loop header
LB: loop body
LE: loop exit
PB: predicated region body
PF: predicated region fallthrough
CT: control target
= control target key end

     0   :  { %s328_s6 = smov 0   ;;  %s330_s7 = smov 0   ;;  %s367_s0 = inlined_call_operand.vmem [shape: f32[64,256], index: 0, kind: input, shape index: {}]   ;;  %s368_s1 = inlined_call_operand.vmem [shape: f32[64,1], index: 1, kind: output, shape index: {}]  }
   0x1   :  { %s332_s8 = smov 0  }
   0x2 LB: > { %s23_s9 = sadd.s32 1, %s311_s7  ;;  %p259_p0 = scmp.ge.s32.totalorder %s315_s8, 1  ;;  %s315_s8 = sphi %s332_s8, %s11_s8   ;;  %s311_s7 = sphi %s330_s7, %s370_s7   ;;  %s307_s6 = sphi %s328_s6, %s369_s6  }
   0x3   : > { %p25_p1 = scmp.ge.s32.totalorder %s23_s9, 4  ;;  %p108_p2 = scmp.lt.s32.totalorder %s315_s8, 5 }
   0x5   : > { %s372_s9 = smov (%p25_p1, %s23_s9), 0  ;;  %p109_p3 = pnand %p259_p0, %p108_p2 }
   0x6   : > { %s260_s10 = sshll.u32 (!%p109_p3), %s307_s6, 1  ;;  %vm165_vm0 = vcmask (!%p109_p3), 7168   ;;  %v317_v3 = vmov (!%p109_p3), 0.0  }
   0x7   : > { %112 = sbr.rel (%p109_p3) target bundleno = 179 (0xb3), region = 24  ;;  %p135_p4 = scmp.lt.s32.totalorder (!%p109_p3), %s260_s10, 7 }
   0xe   : > { %s374_s10 = smov (!%p135_p4, %s260_s10), 7 }
   0xf   : > { %s267_s11 = sshll.u32 %s374_s10, 4  ;;  %s264_s12 = sshll.u32 %s374_s10, 3 }
  0x10   : > { %s142_s15 = scalar_lea.vmem %s367_s0, %s267_s11  ;;  %s149_s18 = scalar_lea.vmem %s368_s1, %s264_s12 }
  0x11   : > { %v151_v0 = vld [vmem:[%s142_s15] sm:$0xff]  ;;  %v152_v1 = vld [vmem:[%s142_s15 + $0x8] sm:$0xff]  ;;  %v153_v2 = vld [vmem:[%s142_s15 + $0x10] sm:$0xff]  ;;  %166 = vst.msk [vmem:[%s149_s18] sm:$0xff] %vm165_vm0, %v317_v3 }
  0x12   : > { %v155_v4 = vadd.f32 %v152_v1, %v151_v0  ;;  %v154_v5 = vld [vmem:[%s142_s15 + $0x18] sm:$0xff]  ;;  %167 = vst.msk [vmem:[%s149_s18 + $0x8] sm:$0xff] %vm165_vm0, %v317_v3 }
  0x13   : > { %v158_v6 = vadd.f32 %v154_v5, %v153_v2 }
  0x14   : > { %156 = vadd.xlane.f32.xlu0 %v155_v4 }
  0x18   : > { %159 = vadd.xlane.f32.xlu0 %v158_v6  ;;  %v168_v7 = vld [vmem:[%s149_s18] sm:$0xff] }
  0x19   : > { %v169_v9 = vld [vmem:[%s149_s18 + $0x8] sm:$0xff] }
  0xa1   : > { %v157_v8 = vpop.xlane.xlu0 %156 }
  0xa2   : > { %v170_v10 = vadd.f32 %v168_v7, %v157_v8 }
  0xa4   : > { %173 = vst.msk [vmem:[%s149_s18] sm:$0xff] %vm165_vm0, %v170_v10 }
  0xa5   : > { %v160_v11 = vpop.xlane.xlu0 %159 }
  0xa6   : > { %v171_v12 = vadd.f32 %v169_v9, %v160_v11 }
  0xa8   : > { %174 = vst.msk [vmem:[%s149_s18 + $0x8] sm:$0xff] %vm165_vm0, %v171_v12 }
  0xab   : > { %v178_v13 = vld [vmem:[%s149_s18] sm:$0xff] }
  0xac   : > { %v180_v15 = vmul.f32 0.00390625, %v178_v13 }
  0xae   : > { %182 = vst.msk [vmem:[%s149_s18] sm:$0xff] %vm165_vm0, %v180_v15 }
  0xaf   : > { %v179_v14 = vld [vmem:[%s149_s18 + $0x8] sm:$0xff] }
  0xb0   : > { %v181_v16 = vmul.f32 0.00390625, %v179_v14 }
  0xb2   : > { %183 = vst.msk [vmem:[%s149_s18 + $0x8] sm:$0xff] %vm165_vm0, %v181_v16 }
  0xb3 PF: > { %s11_s8 = sadd.s32 1, %s315_s8   ;;  %s369_s6 = smov %s311_s7 }
  0xb4   : > { %p8_p5 = scmp.ge.s32.totalorder %s11_s8, 6   ;;  %s370_s7 = smov %s372_s9 }
  0xb6   :  { %10 = sbr.rel (!%p8_p5) target bundleno = 2 (0x2), region = 62 }

// kernel: se_block.4
= control target key start
LH: loop header
LB: loop body
LE: loop exit
PB: predicated region body
PF: predicated region fallthrough
CT: control target
= control target key end

     0   :  { %vm20_vm0 = vcmask 261120   ;;  %v242_v0 = vmov 0.0   ;;  %vm243_vm1 = vmmov 0   ;;  %vm98_vm2 = vcmask 15360   ;;  %s291_s1 = inlined_call_operand.vmem [shape: f32[2,32], index: 1, kind: input, shape index: {}]   ;;  %s292_s0 = inlined_call_operand.vmem [shape: f32[2,32], index: 0, kind: input, shape index: {}]   ;;  %s293_s2 = inlined_call_operand.vmem [shape: f32[32,2], index: 2, kind: input, shape index: {}]   ;;  %s294_s3 = inlined_call_operand.vmem [shape: f32[2,32], index: 3, kind: output, shape index: {}]  }
   0x1   :  { %211 = vmatprep.subr.mxu0 %v242_v0  ;;  %v14_v1 = vld [vmem:[%s291_s1] sm:$0x3]  ;;  %213 = vmatprep.mubr.msk.f32.mxu0 %vm243_vm1, %v242_v0  ;;  %v244_v4 = vmov 0.0|0.0   ;;  %v16_v5 = vld [vmem:[%s293_s2 + $0x8] sm:$0xff]  ;;  %vm229_vm3 = vmpackc.low %vm98_vm2, %vm98_vm2  ;;  %vm190_vm4 = vcmask 254976  }
   0x2   :  { %v15_v2 = vld [vmem:[%s293_s2] sm:$0xff]  ;;  %212 = vmatpush3.xpose.msk.msra.mxu0 %vm20_vm0, %v14_v1  ;;  %227 = vmatprep.subr.bf16.mxu1 %v244_v4  ;;  %v17_v7 = vld [vmem:[%s293_s2 + $0x10] sm:$0xff]  ;;  %v18_v8 = vld [vmem:[%s293_s2 + $0x18] sm:$0xff] }
   0x3   :  { %v19_v3 = vld [vmem:[%s292_s0] sm:$0x3]  ;;  %v228_v6 = vpack.c.bf16 %v16_v5, %v15_v2  ;;  %224 = vmatprep.mubr.msk.f32.mxu1 %vm243_vm1, %v242_v0  ;;  %v232_v9 = vpack.c.bf16 %v18_v8, %v17_v7 }
   0x5   :  { %214 = vmatmul.mubr.msk.f32.vlgmr.msra.gmra.mrb[0].mxu0 %vm20_vm0, %v19_v3  ;;  %230 = vmatpush3.bf16.xpose.msk.msra.mxu1 %vm229_vm3, %v228_v6 }
   0x6   :  { %231 = vmatprep.subr.bf16.mxu1 %v244_v4 }
   0xd   :  { %234 = vmatpush3.bf16.xpose.msk.msra.mxu1 %vm229_vm3, %v232_v9 }
  0xd8   :  { %v93_v10 = vpop.f32.mrb[0].mxu0 }
  0xd9   :  { %v97_v11 = vmax.f32 %v93_v10, 0.0  ;;  %v215_v12 = vpop.f32.mrb[1].mxu0 }
  0xdb   :  { %225 = vmatmul.mubr.msk.f32.vlgmr.msra.gmra.mrb[0].mxu1 %vm98_vm2, %v97_v11 }
 0x1ae   :  { %v180_v13 = vpop.f32.mrb[0].mxu1 }
 0x1af   :  { %v203_v14 = vmul.f32 -1.442695, %v180_v13  ;;  %v226_v15 = vpop.f32.mrb[1].mxu1 }
 0x1b1   :  { %238 = vpow2.f32 %v203_v14 }
 0x1bb   :  { %v239_v16 = vpop.eup %238 }
 0x1bc   :  { %v187_v17 = vadd.f32 1.0, %v239_v16 }
 0x1be   :  { %240 = vrcp.f32 %v187_v17 }
 0x1c8   :  { %v241_v18 = vpop.eup %240 }
 0x1c9   :  { %191 = vst.msk [vmem:[%s294_s3] sm:$0x3] %vm190_vm4, %v241_v18 }

// kernel: se_block.5
= control target key start
LH: loop header
LB: loop body
LE: loop exit
PB: predicated region body
PF: predicated region fallthrough
CT: control target
= control target key end

     0   :  { %s422_s9 = smov 0   ;;  %s424_s10 = smov 0   ;;  %s458_s0 = inlined_call_operand.vmem [shape: f32[64,1], index: 0, kind: input, shape index: {}]   ;;  %s459_s1 = inlined_call_operand.vmem [shape: f32[64,256], index: 1, kind: input, shape index: {}]   ;;  %s460_s2 = inlined_call_operand.vmem [shape: f32[64,256], index: 2, kind: output, shape index: {}]  }
   0x1   :  { %s426_s11 = smov 0  }
   0x2 LB: > { %s24_s12 = sadd.s32 1, %s400_s10  ;;  %p343_p0 = scmp.ge.s32.totalorder %s404_s11, 1  ;;  %s404_s11 = sphi %s426_s11, %s12_s11   ;;  %s400_s10 = sphi %s424_s10, %s462_s10   ;;  %s396_s9 = sphi %s422_s9, %s461_s9  }
   0x3   : > { %p26_p1 = scmp.ge.s32.totalorder %s24_s12, 4  ;;  %p146_p2 = scmp.lt.s32.totalorder %s404_s11, 5 }
   0x5   : > { %s464_s12 = smov (%p26_p1, %s24_s12), 0  ;;  %p147_p3 = pnand %p343_p0, %p146_p2 }
   0x6   : > { %s344_s13 = sshll.u32 (!%p147_p3), %s396_s9, 1  ;;  %v406_v0 = vmov (!%p147_p3), 0  }
   0x7   : > { %150 = sbr.rel (%p147_p3) target bundleno = 153 (0x99), region = 28  ;;  %381 = vset.pattern.permute.xlu0 (!%p147_p3), %v406_v0  ;;  %p184_p4 = scmp.lt.s32.totalorder (!%p147_p3), %s344_s13, 7 }
   0xe   : > { %s466_s13 = smov (!%p184_p4, %s344_s13), 7 }
   0xf   : > { %s345_s14 = sshll.u32 %s466_s13, 3  ;;  %s354_s18 = sshll.u32 %s466_s13, 4 }
  0x10   : > { %s187_s17 = scalar_lea.vmem %s458_s0, %s345_s14  ;;  %s198_s21 = scalar_lea.vmem %s459_s1, %s354_s18 }
  0x11   : > { %v217_v1 = vld [vmem:[%s187_s17] sm:$0xff]  ;;  %v218_v2 = vld [vmem:[%s187_s17 + $0x8] sm:$0xff]  ;;  %s210_s24 = scalar_lea.vmem %s460_s2, %s354_s18  ;;  %v215_v8 = vld [vmem:[%s198_s21 + $0x10] sm:$0xff] }
  0x12   : > { %221 = vperm.xlu0 %381, %v217_v1   ;;  %v213_v3 = vld [vmem:[%s198_s21] sm:$0xff]  ;;  %v214_v4 = vld [vmem:[%s198_s21 + $0x8] sm:$0xff]  ;;  %v216_v9 = vld [vmem:[%s198_s21 + $0x18] sm:$0xff] }
  0x16   : > { %226 = vperm.xlu0 %381, %v218_v2  }
  0x91   : > { %v222_v5 = vpop.permute.xlu0 %221 }
  0x92   : > { %v229_v6 = vmul.f32 %v222_v5, %v213_v3  ;;  %v230_v7 = vmul.f32 %v222_v5, %v214_v4 }
  0x94   : > { %233 = vst [vmem:[%s210_s24] sm:$0xff] %v229_v6  ;;  %234 = vst [vmem:[%s210_s24 + $0x8] sm:$0xff] %v230_v7 }
  0x95   : > { %v227_v10 = vpop.permute.xlu0 %226 }
  0x96   : > { %v231_v11 = vmul.f32 %v227_v10, %v215_v8  ;;  %v232_v12 = vmul.f32 %v227_v10, %v216_v9 }
  0x98   : > { %235 = vst [vmem:[%s210_s24 + $0x10] sm:$0xff] %v231_v11  ;;  %236 = vst [vmem:[%s210_s24 + $0x18] sm:$0xff] %v232_v12 }
  0x99 PF: > { %s12_s11 = sadd.s32 1, %s404_s11   ;;  %s461_s9 = smov %s400_s10 }
  0x9a   : > { %p9_p5 = scmp.ge.s32.totalorder %s12_s11, 6   ;;  %s462_s10 = smov %s464_s12 }
  0x9c   :  { %11 = sbr.rel (!%p9_p5) target bundleno = 2 (0x2), region = 61 }

</bundles_post_ra>
